<compile_context>
chip_gen: v7x
topology: tpu7x:2x2x1
jax: 0.10.0
libtpu: 0.0.40
codegen_flags: <defaults>
</compile_context>

<pallas_src>
import numpy as np
import jax
import jax.numpy as jnp
from jax.experimental import pallas as pl
from jax.experimental.pallas import tpu as pltpu

INPUT_SIZE = 1
OUTPUT_SIZE = 1
HIDDEN_DIM = 32
N_LAYERS = 2
BATCH = 2
SEQ = 8


def rnn_fc_kernel(x_ref, h_ref, wf_ref, whh1_ref, vec_ref,
                  out_ref, hn_ref, slab_ref):
    """Fused 2-layer tanh RNN recurrence + FC head, fully unrolled over time."""
    H = HIDDEN_DIM

    vec = vec_ref[...]                       # (5, H) packed vector slab
    w0row = vec[0:1, :]                      # (1, H)  W_ih^(0) row (input_size == 1)
    b0 = vec[1:2, :]                         # (1, H)  b_ih^(0) + b_hh^(0)
    b1 = vec[2:3, :]                         # (1, H)  b_ih^(1) + b_hh^(1)
    wfc = vec[3:4, :]                        # (1, H)  FC weight row (output_size == 1)
    bfc = vec[4:5, 0:1]                      # (1, 1)  FC bias

    wf = wf_ref[...]                         # (H, 2H) = [Whh0^T | Wih1^T]
    whh1_t = whh1_ref[...]                   # (H, H)  = Whh1^T
    # Hoisted broadcast (an unrolled loop would re-emit it 8x otherwise).
    b1b = jnp.broadcast_to(b1, (BATCH, H))

    # Hoisted layer-0 input term: xw0[t] = x_t @ Wih0^T + b0, all steps at once (VPU).
    xw0 = x_ref[...] * w0row[None, :, :] + b0[None, :, :]      # (S, B, H)

    h0 = h_ref[0, :, :]                      # (B, H) layer-0 state
    h1 = h_ref[1, :, :]                      # (B, H) layer-1 state

    # Prologue fused dot on the initial layer-0 state (only the first H columns
    # are consumed, at t == 0).
    p = jnp.dot(h0, wf, preferred_element_type=jnp.float32)    # (B, 2H)

    for t in range(SEQ):                     # static trip count -> full unroll
        # Layer-1 recurrence term: depends only on h1(t-1); executes in the
        # shadow of the layer-0 critical chain.
        rec1 = jnp.dot(h1, whh1_t, preferred_element_type=jnp.float32) + b1b
        # Layer-0 update: p[:, :H] is h0(t-1) @ Whh0^T from the previous fused dot.
        h0 = jnp.tanh(xw0[t] + p[:, :H])
        # The single MXU dot on the serial chain: columns [0,H) feed the layer-0
        # recurrence at t+1, columns [H,2H) are the layer-1 input term at t.
        p = jnp.dot(h0, wf, preferred_element_type=jnp.float32)
        # Layer-1 update.
        h1 = jnp.tanh(p[:, H:] + rec1)
        # Per-step static store (leading-dim index) into the time-major slab.
        slab_ref[t, :, :] = h1

    hn_ref[0, :, :] = h0
    hn_ref[1, :, :] = h1

    # FC head over all B*S rows: VPU multiply + lane reduction (keep MXU out of
    # the epilogue). Row order matches r_out.view(-1, H) with batch_first.
    slab = slab_ref[...]                                        # (S, B, H)
    r_out = jnp.swapaxes(slab, 0, 1).reshape(BATCH * SEQ, H)    # batch-major rows
    out_ref[...] = jnp.sum(r_out * wfc, axis=-1, keepdims=True) + bfc


@jax.jit
def rnn_forward(x, hidden, params):
    """x: (B, S, input_size) f32, hidden: (n_layers, B, hidden_dim) f32."""
    wih0, whh0, bih0, bhh0, wih1, whh1, bih1, bhh1, wfc, bfc = params

    # One-time layout plumbing in the wrapper (free for XLA), not compute hoisting.
    x_tm = jnp.transpose(x, (1, 0, 2))                      # time-major (S, B, 1)
    w_f = jnp.concatenate([whh0.T, wih1.T], axis=1)         # (H, 2H)
    whh1_t = whh1.T                                         # (H, H)
    vec = jnp.stack([
        wih0[:, 0],                                         # W_ih^(0) row (input_size == 1)
        (bih0 + bhh0)[0],                                   # fused layer-0 bias
        (bih1 + bhh1)[0],                                   # fused layer-1 bias
        wfc[0],                                             # FC weight row
        jnp.broadcast_to(bfc[0, 0], (HIDDEN_DIM,)),         # FC bias (lane 0 used)
    ], axis=0)                                              # (5, H)

    vmem = pl.BlockSpec(memory_space=pltpu.MemorySpace.VMEM)
    out_shapes = (
        jax.ShapeDtypeStruct((BATCH * SEQ, OUTPUT_SIZE), jnp.float32),
        jax.ShapeDtypeStruct((N_LAYERS, BATCH, HIDDEN_DIM), jnp.float32),
    )
    # Tiny shapes: grid-less single invocation (a grid would be pure serial
    # overhead here); all operands resident in VMEM.
    return pl.pallas_call(
        rnn_fc_kernel,
        out_shape=out_shapes,
        in_specs=[vmem] * 5,
        out_specs=(vmem, vmem),
        scratch_shapes=[pltpu.VMEM((SEQ, BATCH, HIDDEN_DIM), jnp.float32)],
    )(x_tm, hidden, w_f, whh1_t, vec)


def reference(x, h0, params):
    """Pure-JAX reference matching torch nn.RNN(tanh, batch_first) + Linear."""
    wih0, whh0, bih0, bhh0, wih1, whh1, bih1, bhh1, wfc, bfc = params
    layer_params = [(wih0, whh0, bih0, bhh0), (wih1, whh1, bih1, bhh1)]
    hn = []
    layer_in = x
    for l, (wih, whh, bih, bhh) in enumerate(layer_params):
        h = h0[l]
        outs = []
        for t in range(SEQ):
            h = jnp.tanh(layer_in[:, t, :] @ wih.T + bih[0]
                         + h @ whh.T + bhh[0])
            outs.append(h)
        layer_in = jnp.stack(outs, axis=1)
        hn.append(h)
    r_out = layer_in.reshape(-1, HIDDEN_DIM)
    out = r_out @ wfc.T + bfc[0]
    return out, jnp.stack(hn, axis=0)


def init_params(key):
    k = 1.0 / np.sqrt(HIDDEN_DIM)
    keys = jax.random.split(key, 10)
    u = lambda kk, shape: jax.random.uniform(kk, shape, jnp.float32, -k, k)
    wih0 = u(keys[0], (HIDDEN_DIM, INPUT_SIZE))
    whh0 = u(keys[1], (HIDDEN_DIM, HIDDEN_DIM))
    bih0 = u(keys[2], (1, HIDDEN_DIM))
    bhh0 = u(keys[3], (1, HIDDEN_DIM))
    wih1 = u(keys[4], (HIDDEN_DIM, HIDDEN_DIM))
    whh1 = u(keys[5], (HIDDEN_DIM, HIDDEN_DIM))
    bih1 = u(keys[6], (1, HIDDEN_DIM))
    bhh1 = u(keys[7], (1, HIDDEN_DIM))
    wfc = u(keys[8], (OUTPUT_SIZE, HIDDEN_DIM))
    bfc = u(keys[9], (1, OUTPUT_SIZE))
    return (wih0, whh0, bih0, bhh0, wih1, whh1, bih1, bhh1, wfc, bfc)


if __name__ == "__main__":
    root = jax.random.PRNGKey(0)
    k_x, k_p = jax.random.split(root)

    # Synthetic sine-like scalar sequence consistent with the original script,
    # plus a zero initial hidden state (PyTorch default when hidden is None).
    x = jax.random.normal(k_x, (BATCH, SEQ, INPUT_SIZE), dtype=jnp.float32)
    h0 = jnp.zeros((N_LAYERS, BATCH, HIDDEN_DIM), dtype=jnp.float32)
    params = init_params(k_p)

    out, hn = rnn_forward(x, h0, params)
    out, hn = jax.block_until_ready((out, hn))

    ref_out, ref_hn = reference(x, h0, params)
    np.testing.assert_allclose(np.asarray(out), np.asarray(ref_out),
                               rtol=1e-5, atol=1e-5)
    np.testing.assert_allclose(np.asarray(hn), np.asarray(ref_hn),
                               rtol=1e-5, atol=1e-5)

    print("KERNEL_OK")
</pallas_src>

<mosaic_0001>
module attributes {stable_mosaic.version = 11 : i64} {
  func.func @rnn_fc_kernel(%arg0: memref<8x2x1xf32, #tpu.memory_space<vmem>>, %arg1: memref<2x2x32xf32, #tpu.memory_space<vmem>>, %arg2: memref<32x64xf32, #tpu.memory_space<vmem>>, %arg3: memref<32x32xf32, #tpu.memory_space<vmem>>, %arg4: memref<5x32xf32, #tpu.memory_space<vmem>>, %arg5: memref<16x1xf32, #tpu.memory_space<vmem>>, %arg6: memref<2x2x32xf32, #tpu.memory_space<vmem>>, %arg7: memref<8x2x32xf32, #tpu.memory_space<vmem>>) attributes {dimension_semantics = [], scalar_prefetch = 0 : i64, scratch_operands = 1 : i64, tpu.core_type = #tpu.core_type<tc>} {
    %c0 = arith.constant 0 : index
    %c0_0 = arith.constant 0 : index
    %0 = vector.load %arg4[%c0, %c0_0] : memref<5x32xf32, #tpu.memory_space<vmem>>, vector<5x32xf32>
    %1 = vector.extract_strided_slice %0 {offsets = [0, 0], sizes = [1, 32], strides = [1, 1]} : vector<5x32xf32> to vector<1x32xf32>
    %2 = vector.extract_strided_slice %0 {offsets = [1, 0], sizes = [1, 32], strides = [1, 1]} : vector<5x32xf32> to vector<1x32xf32>
    %3 = vector.extract_strided_slice %0 {offsets = [2, 0], sizes = [1, 32], strides = [1, 1]} : vector<5x32xf32> to vector<1x32xf32>
    %4 = vector.extract_strided_slice %0 {offsets = [3, 0], sizes = [1, 32], strides = [1, 1]} : vector<5x32xf32> to vector<1x32xf32>
    %5 = vector.extract_strided_slice %0 {offsets = [4, 0], sizes = [1, 1], strides = [1, 1]} : vector<5x32xf32> to vector<1x1xf32>
    %c0_1 = arith.constant 0 : index
    %c0_2 = arith.constant 0 : index
    %6 = vector.load %arg2[%c0_1, %c0_2] : memref<32x64xf32, #tpu.memory_space<vmem>>, vector<32x64xf32>
    %c0_3 = arith.constant 0 : index
    %c0_4 = arith.constant 0 : index
    %7 = vector.load %arg3[%c0_3, %c0_4] : memref<32x32xf32, #tpu.memory_space<vmem>>, vector<32x32xf32>
    %8 = vector.shape_cast %3 : vector<1x32xf32> to vector<1x32xf32>
    %9 = vector.broadcast %8 : vector<1x32xf32> to vector<2x32xf32>
    %c0_5 = arith.constant 0 : index
    %c0_6 = arith.constant 0 : index
    %c0_7 = arith.constant 0 : index
    %10 = vector.load %arg0[%c0_5, %c0_6, %c0_7] : memref<8x2x1xf32, #tpu.memory_space<vmem>>, vector<8x2x1xf32>
    %11 = vector.shape_cast %1 : vector<1x32xf32> to vector<1x1x32xf32>
    %12 = vector.broadcast %10 : vector<8x2x1xf32> to vector<8x2x32xf32>
    %13 = vector.broadcast %11 : vector<1x1x32xf32> to vector<8x2x32xf32>
    %14 = arith.mulf %12, %13 : vector<8x2x32xf32>
    %15 = vector.shape_cast %2 : vector<1x32xf32> to vector<1x1x32xf32>
    %16 = vector.broadcast %15 : vector<1x1x32xf32> to vector<8x2x32xf32>
    %17 = arith.addf %14, %16 : vector<8x2x32xf32>
    %c0_8 = arith.constant 0 : index
    %c0_9 = arith.constant 0 : index
    %c0_10 = arith.constant 0 : index
    %18 = vector.load %arg1[%c0_8, %c0_9, %c0_10] : memref<2x2x32xf32, #tpu.memory_space<vmem>>, vector<1x2x32xf32>
    %19 = vector.shape_cast %18 : vector<1x2x32xf32> to vector<2x32xf32>
    %c1 = arith.constant 1 : index
    %c0_11 = arith.constant 0 : index
    %c0_12 = arith.constant 0 : index
    %20 = vector.load %arg1[%c1, %c0_11, %c0_12] : memref<2x2x32xf32, #tpu.memory_space<vmem>>, vector<1x2x32xf32>
    %21 = vector.shape_cast %20 : vector<1x2x32xf32> to vector<2x32xf32>
    %cst = arith.constant dense<0.000000e+00> : vector<2x64xf32>
    %22 = tpu.matmul %19, %6, %cst {dimension_numbers = #tpu.dot_dimension_numbers<[1], [0], [0], [1], [0, 0, 1, 1], [], []>} : vector<2x32xf32>, vector<32x64xf32>, vector<2x64xf32> -> vector<2x64xf32>
    %cst_13 = arith.constant dense<0.000000e+00> : vector<2x32xf32>
    %23 = tpu.matmul %21, %7, %cst_13 {dimension_numbers = #tpu.dot_dimension_numbers<[1], [0], [0], [1], [0, 0, 1, 1], [], []>} : vector<2x32xf32>, vector<32x32xf32>, vector<2x32xf32> -> vector<2x32xf32>
    %24 = arith.addf %23, %9 : vector<2x32xf32>
    %25 = vector.extract_strided_slice %17 {offsets = [0, 0, 0], sizes = [1, 2, 32], strides = [1, 1, 1]} : vector<8x2x32xf32> to vector<1x2x32xf32>
    %26 = vector.shape_cast %25 : vector<1x2x32xf32> to vector<2x32xf32>
    %27 = vector.extract_strided_slice %22 {offsets = [0, 0], sizes = [2, 32], strides = [1, 1]} : vector<2x64xf32> to vector<2x32xf32>
    %28 = arith.addf %26, %27 : vector<2x32xf32>
    %29 = math.tanh %28 : vector<2x32xf32>
    %cst_14 = arith.constant dense<0.000000e+00> : vector<2x64xf32>
    %30 = tpu.matmul %29, %6, %cst_14 {dimension_numbers = #tpu.dot_dimension_numbers<[1], [0], [0], [1], [0, 0, 1, 1], [], []>} : vector<2x32xf32>, vector<32x64xf32>, vector<2x64xf32> -> vector<2x64xf32>
    %31 = vector.extract_strided_slice %30 {offsets = [0, 32], sizes = [2, 32], strides = [1, 1]} : vector<2x64xf32> to vector<2x32xf32>
    %32 = arith.addf %31, %24 : vector<2x32xf32>
    %33 = math.tanh %32 : vector<2x32xf32>
    %c0_15 = arith.constant 0 : index
    %c0_16 = arith.constant 0 : index
    %c0_17 = arith.constant 0 : index
    %34 = vector.load %arg7[%c0_15, %c0_16, %c0_17] : memref<8x2x32xf32, #tpu.memory_space<vmem>>, vector<1x2x32xf32>
    %35 = vector.shape_cast %34 : vector<1x2x32xf32> to vector<2x32xf32>
    %36 = vector.shape_cast %33 : vector<2x32xf32> to vector<1x2x32xf32>
    tpu.vector_store %arg7[%c0_15, %c0_16, %c0_17], %36 {strides = array<i32>} : memref<8x2x32xf32, #tpu.memory_space<vmem>>, vector<1x2x32xf32>,
    %cst_18 = arith.constant dense<0.000000e+00> : vector<2x32xf32>
    %37 = tpu.matmul %33, %7, %cst_18 {dimension_numbers = #tpu.dot_dimension_numbers<[1], [0], [0], [1], [0, 0, 1, 1], [], []>} : vector<2x32xf32>, vector<32x32xf32>, vector<2x32xf32> -> vector<2x32xf32>
    %38 = arith.addf %37, %9 : vector<2x32xf32>
    %39 = vector.extract_strided_slice %17 {offsets = [1, 0, 0], sizes = [1, 2, 32], strides = [1, 1, 1]} : vector<8x2x32xf32> to vector<1x2x32xf32>
    %40 = vector.shape_cast %39 : vector<1x2x32xf32> to vector<2x32xf32>
    %41 = vector.extract_strided_slice %30 {offsets = [0, 0], sizes = [2, 32], strides = [1, 1]} : vector<2x64xf32> to vector<2x32xf32>
    %42 = arith.addf %40, %41 : vector<2x32xf32>
    %43 = math.tanh %42 : vector<2x32xf32>
    %cst_19 = arith.constant dense<0.000000e+00> : vector<2x64xf32>
    %44 = tpu.matmul %43, %6, %cst_19 {dimension_numbers = #tpu.dot_dimension_numbers<[1], [0], [0], [1], [0, 0, 1, 1], [], []>} : vector<2x32xf32>, vector<32x64xf32>, vector<2x64xf32> -> vector<2x64xf32>
    %45 = vector.extract_strided_slice %44 {offsets = [0, 32], sizes = [2, 32], strides = [1, 1]} : vector<2x64xf32> to vector<2x32xf32>
    %46 = arith.addf %45, %38 : vector<2x32xf32>
    %47 = math.tanh %46 : vector<2x32xf32>
    %c1_20 = arith.constant 1 : index
    %c0_21 = arith.constant 0 : index
    %c0_22 = arith.constant 0 : index
    %48 = vector.load %arg7[%c1_20, %c0_21, %c0_22] : memref<8x2x32xf32, #tpu.memory_space<vmem>>, vector<1x2x32xf32>
    %49 = vector.shape_cast %48 : vector<1x2x32xf32> to vector<2x32xf32>
    %50 = vector.shape_cast %47 : vector<2x32xf32> to vector<1x2x32xf32>
    tpu.vector_store %arg7[%c1_20, %c0_21, %c0_22], %50 {strides = array<i32>} : memref<8x2x32xf32, #tpu.memory_space<vmem>>, vector<1x2x32xf32>,
    %cst_23 = arith.constant dense<0.000000e+00> : vector<2x32xf32>
    %51 = tpu.matmul %47, %7, %cst_23 {dimension_numbers = #tpu.dot_dimension_numbers<[1], [0], [0], [1], [0, 0, 1, 1], [], []>} : vector<2x32xf32>, vector<32x32xf32>, vector<2x32xf32> -> vector<2x32xf32>
    %52 = arith.addf %51, %9 : vector<2x32xf32>
    %53 = vector.extract_strided_slice %17 {offsets = [2, 0, 0], sizes = [1, 2, 32], strides = [1, 1, 1]} : vector<8x2x32xf32> to vector<1x2x32xf32>
    %54 = vector.shape_cast %53 : vector<1x2x32xf32> to vector<2x32xf32>
    %55 = vector.extract_strided_slice %44 {offsets = [0, 0], sizes = [2, 32], strides = [1, 1]} : vector<2x64xf32> to vector<2x32xf32>
    %56 = arith.addf %54, %55 : vector<2x32xf32>
    %57 = math.tanh %56 : vector<2x32xf32>
    %cst_24 = arith.constant dense<0.000000e+00> : vector<2x64xf32>
    %58 = tpu.matmul %57, %6, %cst_24 {dimension_numbers = #tpu.dot_dimension_numbers<[1], [0], [0], [1], [0, 0, 1, 1], [], []>} : vector<2x32xf32>, vector<32x64xf32>, vector<2x64xf32> -> vector<2x64xf32>
    %59 = vector.extract_strided_slice %58 {offsets = [0, 32], sizes = [2, 32], strides = [1, 1]} : vector<2x64xf32> to vector<2x32xf32>
    %60 = arith.addf %59, %52 : vector<2x32xf32>
    %61 = math.tanh %60 : vector<2x32xf32>
    %c2 = arith.constant 2 : index
    %c0_25 = arith.constant 0 : index
    %c0_26 = arith.constant 0 : index
    %62 = vector.load %arg7[%c2, %c0_25, %c0_26] : memref<8x2x32xf32, #tpu.memory_space<vmem>>, vector<1x2x32xf32>
    %63 = vector.shape_cast %62 : vector<1x2x32xf32> to vector<2x32xf32>
    %64 = vector.shape_cast %61 : vector<2x32xf32> to vector<1x2x32xf32>
    tpu.vector_store %arg7[%c2, %c0_25, %c0_26], %64 {strides = array<i32>} : memref<8x2x32xf32, #tpu.memory_space<vmem>>, vector<1x2x32xf32>,
    %cst_27 = arith.constant dense<0.000000e+00> : vector<2x32xf32>
    %65 = tpu.matmul %61, %7, %cst_27 {dimension_numbers = #tpu.dot_dimension_numbers<[1], [0], [0], [1], [0, 0, 1, 1], [], []>} : vector<2x32xf32>, vector<32x32xf32>, vector<2x32xf32> -> vector<2x32xf32>
    %66 = arith.addf %65, %9 : vector<2x32xf32>
    %67 = vector.extract_strided_slice %17 {offsets = [3, 0, 0], sizes = [1, 2, 32], strides = [1, 1, 1]} : vector<8x2x32xf32> to vector<1x2x32xf32>
    %68 = vector.shape_cast %67 : vector<1x2x32xf32> to vector<2x32xf32>
    %69 = vector.extract_strided_slice %58 {offsets = [0, 0], sizes = [2, 32], strides = [1, 1]} : vector<2x64xf32> to vector<2x32xf32>
    %70 = arith.addf %68, %69 : vector<2x32xf32>
    %71 = math.tanh %70 : vector<2x32xf32>
    %cst_28 = arith.constant dense<0.000000e+00> : vector<2x64xf32>
    %72 = tpu.matmul %71, %6, %cst_28 {dimension_numbers = #tpu.dot_dimension_numbers<[1], [0], [0], [1], [0, 0, 1, 1], [], []>} : vector<2x32xf32>, vector<32x64xf32>, vector<2x64xf32> -> vector<2x64xf32>
    %73 = vector.extract_strided_slice %72 {offsets = [0, 32], sizes = [2, 32], strides = [1, 1]} : vector<2x64xf32> to vector<2x32xf32>
    %74 = arith.addf %73, %66 : vector<2x32xf32>
    %75 = math.tanh %74 : vector<2x32xf32>
    %c3 = arith.constant 3 : index
    %c0_29 = arith.constant 0 : index
    %c0_30 = arith.constant 0 : index
    %76 = vector.load %arg7[%c3, %c0_29, %c0_30] : memref<8x2x32xf32, #tpu.memory_space<vmem>>, vector<1x2x32xf32>
    %77 = vector.shape_cast %76 : vector<1x2x32xf32> to vector<2x32xf32>
    %78 = vector.shape_cast %75 : vector<2x32xf32> to vector<1x2x32xf32>
    tpu.vector_store %arg7[%c3, %c0_29, %c0_30], %78 {strides = array<i32>} : memref<8x2x32xf32, #tpu.memory_space<vmem>>, vector<1x2x32xf32>,
    %cst_31 = arith.constant dense<0.000000e+00> : vector<2x32xf32>
    %79 = tpu.matmul %75, %7, %cst_31 {dimension_numbers = #tpu.dot_dimension_numbers<[1], [0], [0], [1], [0, 0, 1, 1], [], []>} : vector<2x32xf32>, vector<32x32xf32>, vector<2x32xf32> -> vector<2x32xf32>
    %80 = arith.addf %79, %9 : vector<2x32xf32>
    %81 = vector.extract_strided_slice %17 {offsets = [4, 0, 0], sizes = [1, 2, 32], strides = [1, 1, 1]} : vector<8x2x32xf32> to vector<1x2x32xf32>
    %82 = vector.shape_cast %81 : vector<1x2x32xf32> to vector<2x32xf32>
    %83 = vector.extract_strided_slice %72 {offsets = [0, 0], sizes = [2, 32], strides = [1, 1]} : vector<2x64xf32> to vector<2x32xf32>
    %84 = arith.addf %82, %83 : vector<2x32xf32>
    %85 = math.tanh %84 : vector<2x32xf32>
    %cst_32 = arith.constant dense<0.000000e+00> : vector<2x64xf32>
    %86 = tpu.matmul %85, %6, %cst_32 {dimension_numbers = #tpu.dot_dimension_numbers<[1], [0], [0], [1], [0, 0, 1, 1], [], []>} : vector<2x32xf32>, vector<32x64xf32>, vector<2x64xf32> -> vector<2x64xf32>
    %87 = vector.extract_strided_slice %86 {offsets = [0, 32], sizes = [2, 32], strides = [1, 1]} : vector<2x64xf32> to vector<2x32xf32>
    %88 = arith.addf %87, %80 : vector<2x32xf32>
    %89 = math.tanh %88 : vector<2x32xf32>
    %c4 = arith.constant 4 : index
    %c0_33 = arith.constant 0 : index
    %c0_34 = arith.constant 0 : index
    %90 = vector.load %arg7[%c4, %c0_33, %c0_34] : memref<8x2x32xf32, #tpu.memory_space<vmem>>, vector<1x2x32xf32>
    %91 = vector.shape_cast %90 : vector<1x2x32xf32> to vector<2x32xf32>
    %92 = vector.shape_cast %89 : vector<2x32xf32> to vector<1x2x32xf32>
    tpu.vector_store %arg7[%c4, %c0_33, %c0_34], %92 {strides = array<i32>} : memref<8x2x32xf32, #tpu.memory_space<vmem>>, vector<1x2x32xf32>,
    %cst_35 = arith.constant dense<0.000000e+00> : vector<2x32xf32>
    %93 = tpu.matmul %89, %7, %cst_35 {dimension_numbers = #tpu.dot_dimension_numbers<[1], [0], [0], [1], [0, 0, 1, 1], [], []>} : vector<2x32xf32>, vector<32x32xf32>, vector<2x32xf32> -> vector<2x32xf32>
    %94 = arith.addf %93, %9 : vector<2x32xf32>
    %95 = vector.extract_strided_slice %17 {offsets = [5, 0, 0], sizes = [1, 2, 32], strides = [1, 1, 1]} : vector<8x2x32xf32> to vector<1x2x32xf32>
    %96 = vector.shape_cast %95 : vector<1x2x32xf32> to vector<2x32xf32>
    %97 = vector.extract_strided_slice %86 {offsets = [0, 0], sizes = [2, 32], strides = [1, 1]} : vector<2x64xf32> to vector<2x32xf32>
    %98 = arith.addf %96, %97 : vector<2x32xf32>
    %99 = math.tanh %98 : vector<2x32xf32>
    %cst_36 = arith.constant dense<0.000000e+00> : vector<2x64xf32>
    %100 = tpu.matmul %99, %6, %cst_36 {dimension_numbers = #tpu.dot_dimension_numbers<[1], [0], [0], [1], [0, 0, 1, 1], [], []>} : vector<2x32xf32>, vector<32x64xf32>, vector<2x64xf32> -> vector<2x64xf32>
    %101 = vector.extract_strided_slice %100 {offsets = [0, 32], sizes = [2, 32], strides = [1, 1]} : vector<2x64xf32> to vector<2x32xf32>
    %102 = arith.addf %101, %94 : vector<2x32xf32>
    %103 = math.tanh %102 : vector<2x32xf32>
    %c5 = arith.constant 5 : index
    %c0_37 = arith.constant 0 : index
    %c0_38 = arith.constant 0 : index
    %104 = vector.load %arg7[%c5, %c0_37, %c0_38] : memref<8x2x32xf32, #tpu.memory_space<vmem>>, vector<1x2x32xf32>
    %105 = vector.shape_cast %104 : vector<1x2x32xf32> to vector<2x32xf32>
    %106 = vector.shape_cast %103 : vector<2x32xf32> to vector<1x2x32xf32>
    tpu.vector_store %arg7[%c5, %c0_37, %c0_38], %106 {strides = array<i32>} : memref<8x2x32xf32, #tpu.memory_space<vmem>>, vector<1x2x32xf32>,
    %cst_39 = arith.constant dense<0.000000e+00> : vector<2x32xf32>
    %107 = tpu.matmul %103, %7, %cst_39 {dimension_numbers = #tpu.dot_dimension_numbers<[1], [0], [0], [1], [0, 0, 1, 1], [], []>} : vector<2x32xf32>, vector<32x32xf32>, vector<2x32xf32> -> vector<2x32xf32>
    %108 = arith.addf %107, %9 : vector<2x32xf32>
    %109 = vector.extract_strided_slice %17 {offsets = [6, 0, 0], sizes = [1, 2, 32], strides = [1, 1, 1]} : vector<8x2x32xf32> to vector<1x2x32xf32>
    %110 = vector.shape_cast %109 : vector<1x2x32xf32> to vector<2x32xf32>
    %111 = vector.extract_strided_slice %100 {offsets = [0, 0], sizes = [2, 32], strides = [1, 1]} : vector<2x64xf32> to vector<2x32xf32>
    %112 = arith.addf %110, %111 : vector<2x32xf32>
    %113 = math.tanh %112 : vector<2x32xf32>
    %cst_40 = arith.constant dense<0.000000e+00> : vector<2x64xf32>
    %114 = tpu.matmul %113, %6, %cst_40 {dimension_numbers = #tpu.dot_dimension_numbers<[1], [0], [0], [1], [0, 0, 1, 1], [], []>} : vector<2x32xf32>, vector<32x64xf32>, vector<2x64xf32> -> vector<2x64xf32>
    %115 = vector.extract_strided_slice %114 {offsets = [0, 32], sizes = [2, 32], strides = [1, 1]} : vector<2x64xf32> to vector<2x32xf32>
    %116 = arith.addf %115, %108 : vector<2x32xf32>
    %117 = math.tanh %116 : vector<2x32xf32>
    %c6 = arith.constant 6 : index
    %c0_41 = arith.constant 0 : index
    %c0_42 = arith.constant 0 : index
    %118 = vector.load %arg7[%c6, %c0_41, %c0_42] : memref<8x2x32xf32, #tpu.memory_space<vmem>>, vector<1x2x32xf32>
    %119 = vector.shape_cast %118 : vector<1x2x32xf32> to vector<2x32xf32>
    %120 = vector.shape_cast %117 : vector<2x32xf32> to vector<1x2x32xf32>
    tpu.vector_store %arg7[%c6, %c0_41, %c0_42], %120 {strides = array<i32>} : memref<8x2x32xf32, #tpu.memory_space<vmem>>, vector<1x2x32xf32>,
    %cst_43 = arith.constant dense<0.000000e+00> : vector<2x32xf32>
    %121 = tpu.matmul %117, %7, %cst_43 {dimension_numbers = #tpu.dot_dimension_numbers<[1], [0], [0], [1], [0, 0, 1, 1], [], []>} : vector<2x32xf32>, vector<32x32xf32>, vector<2x32xf32> -> vector<2x32xf32>
    %122 = arith.addf %121, %9 : vector<2x32xf32>
    %123 = vector.extract_strided_slice %17 {offsets = [7, 0, 0], sizes = [1, 2, 32], strides = [1, 1, 1]} : vector<8x2x32xf32> to vector<1x2x32xf32>
    %124 = vector.shape_cast %123 : vector<1x2x32xf32> to vector<2x32xf32>
    %125 = vector.extract_strided_slice %114 {offsets = [0, 0], sizes = [2, 32], strides = [1, 1]} : vector<2x64xf32> to vector<2x32xf32>
    %126 = arith.addf %124, %125 : vector<2x32xf32>
    %127 = math.tanh %126 : vector<2x32xf32>
    %cst_44 = arith.constant dense<0.000000e+00> : vector<2x64xf32>
    %128 = tpu.matmul %127, %6, %cst_44 {dimension_numbers = #tpu.dot_dimension_numbers<[1], [0], [0], [1], [0, 0, 1, 1], [], []>} : vector<2x32xf32>, vector<32x64xf32>, vector<2x64xf32> -> vector<2x64xf32>
    %129 = vector.extract_strided_slice %128 {offsets = [0, 32], sizes = [2, 32], strides = [1, 1]} : vector<2x64xf32> to vector<2x32xf32>
    %130 = arith.addf %129, %122 : vector<2x32xf32>
    %131 = math.tanh %130 : vector<2x32xf32>
    %c7 = arith.constant 7 : index
    %c0_45 = arith.constant 0 : index
    %c0_46 = arith.constant 0 : index
    %132 = vector.load %arg7[%c7, %c0_45, %c0_46] : memref<8x2x32xf32, #tpu.memory_space<vmem>>, vector<1x2x32xf32>
    %133 = vector.shape_cast %132 : vector<1x2x32xf32> to vector<2x32xf32>
    %134 = vector.shape_cast %131 : vector<2x32xf32> to vector<1x2x32xf32>
    tpu.vector_store %arg7[%c7, %c0_45, %c0_46], %134 {strides = array<i32>} : memref<8x2x32xf32, #tpu.memory_space<vmem>>, vector<1x2x32xf32>,
    %c0_47 = arith.constant 0 : index
    %c0_48 = arith.constant 0 : index
    %c0_49 = arith.constant 0 : index
    %135 = vector.load %arg6[%c0_47, %c0_48, %c0_49] : memref<2x2x32xf32, #tpu.memory_space<vmem>>, vector<1x2x32xf32>
    %136 = vector.shape_cast %135 : vector<1x2x32xf32> to vector<2x32xf32>
    %137 = vector.shape_cast %127 : vector<2x32xf32> to vector<1x2x32xf32>
    tpu.vector_store %arg6[%c0_47, %c0_48, %c0_49], %137 {strides = array<i32>} : memref<2x2x32xf32, #tpu.memory_space<vmem>>, vector<1x2x32xf32>,
    %c1_50 = arith.constant 1 : index
    %c0_51 = arith.constant 0 : index
    %c0_52 = arith.constant 0 : index
    %138 = vector.load %arg6[%c1_50, %c0_51, %c0_52] : memref<2x2x32xf32, #tpu.memory_space<vmem>>, vector<1x2x32xf32>
    %139 = vector.shape_cast %138 : vector<1x2x32xf32> to vector<2x32xf32>
    %140 = vector.shape_cast %131 : vector<2x32xf32> to vector<1x2x32xf32>
    tpu.vector_store %arg6[%c1_50, %c0_51, %c0_52], %140 {strides = array<i32>} : memref<2x2x32xf32, #tpu.memory_space<vmem>>, vector<1x2x32xf32>,
    %c0_53 = arith.constant 0 : index
    %c0_54 = arith.constant 0 : index
    %c0_55 = arith.constant 0 : index
    %141 = vector.load %arg7[%c0_53, %c0_54, %c0_55] : memref<8x2x32xf32, #tpu.memory_space<vmem>>, vector<8x2x32xf32>
    %142 = tpu.transpose %141, [1, 0, 2] : vector<8x2x32xf32> -> vector<2x8x32xf32>
    %143 = vector.shape_cast %142 : vector<2x8x32xf32> to vector<16x32xf32>
    %144 = vector.broadcast %4 : vector<1x32xf32> to vector<16x32xf32>
    %145 = arith.mulf %143, %144 : vector<16x32xf32>
    %cst_56 = arith.constant dense<0.000000e+00> : vector<16xf32>
    %146 = vector.multi_reduction <add>, %145, %cst_56 [1] : vector<16x32xf32> to vector<16xf32>
    %147 = vector.shape_cast %146 : vector<16xf32> to vector<16x1xf32>
    %148 = vector.broadcast %5 : vector<1x1xf32> to vector<16x1xf32>
    %149 = arith.addf %147, %148 : vector<16x1xf32>
    %c0_57 = arith.constant 0 : index
    %c0_58 = arith.constant 0 : index
    %150 = vector.load %arg5[%c0_57, %c0_58] : memref<16x1xf32, #tpu.memory_space<vmem>>, vector<16x1xf32>
    tpu.vector_store %arg5[%c0_57, %c0_58], %149 {strides = array<i32>} : memref<16x1xf32, #tpu.memory_space<vmem>>, vector<16x1xf32>,
    return
  }
}

</mosaic_0001>

<bundles_post_ra>
// kernel: rnn_forward.1
= control target key start
LH: loop header
LB: loop body
LE: loop exit
PB: predicated region body
PF: predicated region fallthrough
CT: control target
= control target key end

     0   :  { %v2028_v3 = vmov 0.0|0.0   ;;  %vm2029_vm0 = vmmov 0   ;;  %v2030_v6 = vmov 0.0   ;;  %v2031_v8 = vmov 0   ;;  %s2349_s0 = inlined_call_operand.vmem [shape: f32[8,2,1], index: 0, kind: input, shape index: {}]   ;;  %s2350_s1 = inlined_call_operand.vmem [shape: f32[2,2,32], index: 1, kind: input, shape index: {}]   ;;  %s2351_s2 = inlined_call_operand.vmem [shape: f32[32,64], index: 2, kind: input, shape index: {}]   ;;  %s2352_s3 = inlined_call_operand.vmem [shape: f32[32,32], index: 3, kind: input, shape index: {}]   ;;  %s2353_s4 = inlined_call_operand.vmem [shape: f32[5,32], index: 4, kind: input, shape index: {}]   ;;  %s2354_s5 = inlined_call_operand.vmem [shape: f32[16,1], index: 5, kind: output, shape index: {0}]   ;;  %s2355_s6 = inlined_call_operand.hbm [shape: f32[2,2,32], index: 6, kind: output, shape index: {1}]  }
   0x1   :  { %v24_v0 = vld [vmem:[%s2351_s2] sm:$0xff]  ;;  %v25_v1 = vld [vmem:[%s2351_s2 + $0x8] sm:$0xff]  ;;  %v26_v2 = vld [vmem:[%s2351_s2 + $0x10] sm:$0xff]  ;;  %1850 = vmatprep.subr.bf16.mxu0 %v2028_v3  ;;  %1671 = vmatprep.mubr.msk.f32.mxu0 %vm2029_vm0, %v2030_v6 }
   0x2   :  { %v2082_v4 = vpack.c.bf16 %v25_v1, %v24_v0  ;;  %v27_v5 = vld [vmem:[%s2351_s2 + $0x18] sm:$0xff]  ;;  %v28_v7 = vld [vmem:[%s2352_s3] sm:$0xff]  ;;  %1962 = vset.pattern.permute.xlu0 %v2031_v8  ;;  %1856 = vmatprep.subr.bf16.mxu1 %v2028_v3  ;;  %v29_v10 = vld [vmem:[%s2352_s3 + $0x8] sm:$0xff] }
   0x3   :  { %v36_v9 = vld [vmem:[%s2349_s0] sm:$0x3]  ;;  %v30_v11 = vld [vmem:[%s2352_s3 + $0x10] sm:$0xff]  ;;  %v2103_v12 = vpack.c.bf16 %v27_v5, %v26_v2  ;;  %v2105_v13 = vpack.c.bf16 %v29_v10, %v28_v7  ;;  %v31_v14 = vld [vmem:[%s2352_s3 + $0x18] sm:$0xff]  ;;  %1682 = vmatprep.mubr.msk.f32.mxu1 %vm2029_vm0, %v2030_v6 }
   0x4   :  { %1852 = vmatpush3.bf16.msra.mxu0 %v2082_v4  ;;  %46 = vperm.xlu0 %1962, %v36_v9  }
   0x5   :  { %1853 = vmatprep.subr.bf16.mxu0 %v2028_v3 }
   0x6   :  { %12 = vsyncpa [#allocation4], 0  ;;  %1858 = vmatpush3.bf16.msra.mxu1 %v2105_v13  ;;  %v2114_v15 = vpack.c.bf16 %v31_v14, %v30_v11  ;;  %1963 = vset.pattern.permute.xlu1 %v2031_v8  ;;  %v108_v16 = vld [vmem:[%s2350_s1] sm:$0x3]  ;;  %vm111_vm1 = vcmask 261120   ;;  %v32_v18 = vlaneseq  ;;  %s2033_s18 = smov 96  }
   0x7   :  { %1859 = vmatprep.subr.bf16.mxu1 %v2028_v3  ;;  %v1560_v17 = vld [vmem:[%s2350_s1 + $0x2] sm:$0x3]  ;;  %vm343_vm2 = vcmask 254976   ;;  %v38_v52 = vld [vmem:[%s2349_s0 + $0x4] sm:$0x3] }
   0x8   :  { %1855 = vmatpush3.bf16.msra.mxu0 %v2103_v12  ;;  %v2141_v19 = vshrl.u32 %v32_v18, 7  ;;  %v2147_v21 = vld [vmem:[%s2353_s4] sm:$0x1f]  ;;  %s2032_s4 = smov 32   ;;  %v39_v8 = vld [vmem:[%s2349_s0 + $0x6] sm:$0x3] }
   0x9   :  { %1862 = vmatprep.subr.bf16.mxu0 %v2028_v3  ;;  %v37_v42 = vld [vmem:[%s2349_s0 + $0x2] sm:$0x3] }
   0xa   :  { %1861 = vmatpush3.bf16.msra.mxu1 %v2114_v15  ;;  %v86_v20 = vsub.s32 0, %v2141_v19  ;;  %v98_v23 = vsub.s32 1, %v2141_v19  ;;  %v34_v27 = vsub.s32 2, %v2141_v19 }
   0xb   :  { %1672 = vmatmul.mubr.msk.f32.vlgmr.msra.gmra.mrb[0].mxu0 %vm111_vm1, %v108_v16  ;;  %1868 = vmatprep.subr.bf16.mxu1 %v2028_v3 }
   0xc   :  { %1864 = vmatpush3.bf16.msra.mxu0 %v2082_v4  ;;  %1693 = vmatprep.mubr.msk.f32.mxu0 %vm2029_vm0, %v2030_v6  ;;  %v2150_v22 = vrot.slane %v2147_v21, %v86_v20  ;;  %v2155_v26 = vrot.slane %v2147_v21, %v98_v23  ;;  %v2160_v29 = vrot.slane %v2147_v21, %v34_v27 }
   0xd   :  { %1683 = vmatmul.mubr.msk.f32.vlgmr.msra.gmra.mrb[0].mxu1 %vm111_vm1, %v1560_v17  ;;  %1865 = vmatprep.subr.bf16.mxu0 %v2028_v3 }
   0xe   :  { %1870 = vmatpush3.bf16.msra.mxu1 %v2105_v13  ;;  %1704 = vmatprep.mubr.msk.f32.mxu1 %vm2029_vm0, %v2030_v6 }
   0xf   :  { %1871 = vmatprep.subr.bf16.mxu1 %v2028_v3 }
  0x10   :  { %1867 = vmatpush3.bf16.msra.mxu0 %v2103_v12 }
  0x11   :  { %1874 = vmatprep.subr.bf16.mxu0 %v2028_v3 }
  0x12   :  { %1873 = vmatpush3.bf16.msra.mxu1 %v2114_v15 }
  0x13   :  { %1880 = vmatprep.subr.bf16.mxu1 %v2028_v3 }
  0x83   :  { %v47_v24 = vpop.permute.xlu0 %46 }
  0x84   :  { %v88_v25 = vmul.f32 %v2150_v22, %v47_v24 }
  0x86   :  { %v100_v28 = vadd.f32 %v2155_v26, %v88_v25 }
  0xde   :  { %v181_v30 = vpop.f32.mrb[0].mxu0 }
  0xdf   :  { %v258_v31 = vadd.f32 %v181_v30, %v100_v28  ;;  %v1673_v32 = vpop.f32.mrb[1].mxu0 }
  0xe0   :  { %v254_v33 = vpop.f32.mrb[0].mxu1 }
  0xe1   :  { %1968 = vtanh.f32 %v258_v31  ;;  %v255_v34 = vadd.f32 %v254_v33, %v2160_v29  ;;  %v1684_v35 = vpop.f32.mrb[1].mxu1  ;;  %v40_v31 = vld [vmem:[%s2349_s0 + $0x8] sm:$0x3] }
  0xe3   :  { %334 = vrot.lane.b32.xlu0 %v255_v34, %s2032_s4 }
  0xeb   :  { %v1969_v36 = vpop.eup %1968 }
  0xec   :  { %1694 = vmatmul.mubr.msk.f32.vlgmr.msra.gmra.mrb[2].mxu0 %vm111_vm1, %v1969_v36 }
  0xed   :  { %1876 = vmatpush3.bf16.msra.mxu0 %v2082_v4  ;;  %1715 = vmatprep.mubr.msk.f32.mxu0 %vm2029_vm0, %v2030_v6 }
  0xee   :  { %1877 = vmatprep.subr.bf16.mxu0 %v2028_v3 }
  0xf1   :  { %1879 = vmatpush3.bf16.msra.mxu0 %v2103_v12 }
  0xf2   :  { %1886 = vmatprep.subr.bf16.mxu0 %v2028_v3 }
 0x155   :  { %v335_v37 = vpop.permute.xlu0 %334 }
 0x1bf   :  { %v329_v38 = vpop.f32.mrb[2].mxu0 }
 0x1c0   :  { %v337_v39 = vadd.f32 %v335_v37, %v329_v38  ;;  %v1695_v40 = vpop.f32.mrb[3].mxu0 }
 0x1c2   :  { %1970 = vtanh.f32 %v337_v39 }
 0x1cc   :  { %v1971_v41 = vpop.eup %1970 }
 0x1cd   :  { %340 = vrot.lane.b32.xlu1 %v1971_v41, %s2033_s18 }
 0x1d1   :  { %51 = vperm.xlu1 %1963, %v37_v42  }
 0x23f   :  { %v341_v43 = vpop.permute.xlu1 %340 }
 0x240   :  { %344 = vst.msk [vmem:[#allocation2] sm:$0x3] %vm343_vm2, %v341_v43  ;;  %1705 = vmatmul.mubr.msk.f32.vlgmr.msra.gmra.mrb[2].mxu1 %vm111_vm1, %v341_v43 }
 0x241   :  { %1882 = vmatpush3.bf16.msra.mxu1 %v2105_v13  ;;  %1726 = vmatprep.mubr.msk.f32.mxu1 %vm2029_vm0, %v2030_v6 }
 0x242   :  { %1883 = vmatprep.subr.bf16.mxu1 %v2028_v3 }
 0x245   :  { %1885 = vmatpush3.bf16.msra.mxu1 %v2114_v15 }
 0x246   :  { %1892 = vmatprep.subr.bf16.mxu1 %v2028_v3 }
 0x250   :  { %v52_v44 = vpop.permute.xlu1 %51 }
 0x251   :  { %v89_v45 = vmul.f32 %v2150_v22, %v52_v44 }
 0x253   :  { %v101_v46 = vadd.f32 %v2155_v26, %v89_v45 }
 0x255   :  { %v417_v47 = vadd.f32 %v329_v38, %v101_v46  ;;  %v41_v46 = vld [vmem:[%s2349_s0 + $0xa] sm:$0x3] }
 0x257   :  { %1972 = vtanh.f32 %v417_v47 }
 0x261   :  { %v1973_v48 = vpop.eup %1972 }
 0x262   :  { %1716 = vmatmul.mubr.msk.f32.vlgmr.msra.gmra.mrb[4].mxu0 %vm111_vm1, %v1973_v48 }
 0x263   :  { %1888 = vmatpush3.bf16.msra.mxu0 %v2082_v4  ;;  %1737 = vmatprep.mubr.msk.f32.mxu0 %vm2029_vm0, %v2030_v6 }
 0x264   :  { %1889 = vmatprep.subr.bf16.mxu0 %v2028_v3 }
 0x267   :  { %1891 = vmatpush3.bf16.msra.mxu0 %v2103_v12 }
 0x268   :  { %1898 = vmatprep.subr.bf16.mxu0 %v2028_v3 }
 0x313   :  { %v413_v49 = vpop.f32.mrb[2].mxu1 }
 0x314   :  { %v414_v50 = vadd.f32 %v413_v49, %v2160_v29  ;;  %v1706_v51 = vpop.f32.mrb[3].mxu1 }
 0x316   :  { %493 = vrot.lane.b32.xlu0 %v414_v50, %s2032_s4 }
 0x31a   :  { %56 = vperm.xlu0 %1962, %v38_v52  }
 0x335   :  { %v488_v53 = vpop.f32.mrb[4].mxu0 }
 0x336   :  { %v1717_v54 = vpop.f32.mrb[5].mxu0 }
 0x388   :  { %v494_v55 = vpop.permute.xlu0 %493 }
 0x389   :  { %v496_v56 = vadd.f32 %v494_v55, %v488_v53 }
 0x38b   :  { %1974 = vtanh.f32 %v496_v56 }
 0x395   :  { %v1975_v57 = vpop.eup %1974 }
 0x396   :  { %499 = vrot.lane.b32.xlu1 %v1975_v57, %s2033_s18 }
 0x399   :  { %v57_v58 = vpop.permute.xlu0 %56 }
 0x39a   :  { %v90_v59 = vmul.f32 %v2150_v22, %v57_v58 }
 0x39c   :  { %v102_v60 = vadd.f32 %v2155_v26, %v90_v59 }
 0x39e   :  { %v576_v61 = vadd.f32 %v488_v53, %v102_v60 }
 0x3a0   :  { %1976 = vtanh.f32 %v576_v61  ;;  %v42_v61 = vld [vmem:[%s2349_s0 + $0xc] sm:$0x3] }
 0x3aa   :  { %v1977_v62 = vpop.eup %1976 }
 0x3ab   :  { %1738 = vmatmul.mubr.msk.f32.vlgmr.msra.gmra.mrb[6].mxu0 %vm111_vm1, %v1977_v62 }
 0x3ac   :  { %1900 = vmatpush3.bf16.msra.mxu0 %v2082_v4  ;;  %1759 = vmatprep.mubr.msk.f32.mxu0 %vm2029_vm0, %v2030_v6 }
 0x3ad   :  { %1901 = vmatprep.subr.bf16.mxu0 %v2028_v3 }
 0x3b0   :  { %1903 = vmatpush3.bf16.msra.mxu0 %v2103_v12 }
 0x3b1   :  { %1910 = vmatprep.subr.bf16.mxu0 %v2028_v3 }
 0x408   :  { %v500_v63 = vpop.permute.xlu1 %499 }
 0x409   :  { %503 = vst.msk [vmem:[#allocation2 + $0x2] sm:$0x3] %vm343_vm2, %v500_v63  ;;  %1727 = vmatmul.mubr.msk.f32.vlgmr.msra.gmra.mrb[4].mxu1 %vm111_vm1, %v500_v63 }
 0x40a   :  { %1894 = vmatpush3.bf16.msra.mxu1 %v2105_v13  ;;  %1748 = vmatprep.mubr.msk.f32.mxu1 %vm2029_vm0, %v2030_v6 }
 0x40b   :  { %1895 = vmatprep.subr.bf16.mxu1 %v2028_v3 }
 0x40e   :  { %1897 = vmatpush3.bf16.msra.mxu1 %v2114_v15 }
 0x40f   :  { %1904 = vmatprep.subr.bf16.mxu1 %v2028_v3 }
 0x47e   :  { %v647_v0 = vpop.f32.mrb[6].mxu0 }
 0x47f   :  { %v1739_v1 = vpop.f32.mrb[7].mxu0 }
 0x4dc   :  { %v572_v2 = vpop.f32.mrb[4].mxu1 }
 0x4dd   :  { %v573_v5 = vadd.f32 %v572_v2, %v2160_v29  ;;  %v1728_v7 = vpop.f32.mrb[5].mxu1 }
 0x4df   :  { %652 = vrot.lane.b32.xlu1 %v573_v5, %s2032_s4 }
 0x4e3   :  { %61 = vperm.xlu1 %1963, %v39_v8  }
 0x551   :  { %v653_v9 = vpop.permute.xlu1 %652 }
 0x552   :  { %v655_v10 = vadd.f32 %v653_v9, %v647_v0 }
 0x554   :  { %1978 = vtanh.f32 %v655_v10 }
 0x55e   :  { %v1979_v11 = vpop.eup %1978 }
 0x55f   :  { %658 = vrot.lane.b32.xlu0 %v1979_v11, %s2033_s18 }
 0x562   :  { %v62_v14 = vpop.permute.xlu1 %61 }
 0x563   :  { %v91_v16 = vmul.f32 %v2150_v22, %v62_v14 }
 0x565   :  { %v103_v17 = vadd.f32 %v2155_v26, %v91_v16  ;;  %v43_v16 = vld [vmem:[%s2349_s0 + $0xe] sm:$0x3]  ;;  %s2035_s0 = smov [#allocation3]  }
 0x566   :  { %s1547_s9 = sshll.u32 %s2035_s0, 4  ;;  %s1548_s9 = int_to_ptr.vmem [resolvable:$true] %s1547_s9 }
 0x567   :  { %v735_v18 = vadd.f32 %v647_v0, %v103_v17  ;;  %s2004_s10 = scalar_lea.vmem %s1548_s9, 64  ;;  %p2009_p1 = scmp.lt.s32.totalorder %s1548_s9, %s1548_s9 }
 0x568   :  { %p2005_p0 = scmp.ne.s32.totalorder %s1548_s9, %s2004_s10  ;;  %p2010_p2 = scmp.lt.s32.totalorder %s2004_s10, %s2004_s10 }
 0x569   :  { %1980 = vtanh.f32 %v735_v18 }
 0x56a   :  { %p2011_p3 = por %p2010_p2, %p2009_p1 }
 0x56c   :  { %p2012_p4 = pnand %p2011_p3, %p2005_p0 }
 0x573   :  { %v1981_v20 = vpop.eup %1980 }
 0x574   :  { %1760 = vmatmul.mubr.msk.f32.vlgmr.msra.gmra.mrb[8].mxu0 %vm111_vm1, %v1981_v20 }
 0x575   :  { %1912 = vmatpush3.bf16.msra.mxu0 %v2082_v4  ;;  %1781 = vmatprep.mubr.msk.f32.mxu0 %vm2029_vm0, %v2030_v6 }
 0x576   :  { %1913 = vmatprep.subr.bf16.mxu0 %v2028_v3 }
 0x579   :  { %1915 = vmatpush3.bf16.msra.mxu0 %v2103_v12 }
 0x57a   :  { %1922 = vmatprep.subr.bf16.mxu0 %v2028_v3 }
 0x5d1   :  { %v659_v23 = vpop.permute.xlu0 %658 }
 0x5d2   :  { %662 = vst.msk [vmem:[#allocation2 + $0x4] sm:$0x3] %vm343_vm2, %v659_v23  ;;  %1749 = vmatmul.mubr.msk.f32.vlgmr.msra.gmra.mrb[6].mxu1 %vm111_vm1, %v659_v23 }
 0x5d3   :  { %1906 = vmatpush3.bf16.msra.mxu1 %v2105_v13  ;;  %1770 = vmatprep.mubr.msk.f32.mxu1 %vm2029_vm0, %v2030_v6 }
 0x5d4   :  { %1907 = vmatprep.subr.bf16.mxu1 %v2028_v3 }
 0x5d7   :  { %1909 = vmatpush3.bf16.msra.mxu1 %v2114_v15 }
 0x5d8   :  { %1916 = vmatprep.subr.bf16.mxu1 %v2028_v3 }
 0x647   :  { %v806_v24 = vpop.f32.mrb[8].mxu0 }
 0x648   :  { %v1761_v25 = vpop.f32.mrb[9].mxu0 }
 0x6a5   :  { %v731_v27 = vpop.f32.mrb[6].mxu1 }
 0x6a6   :  { %v732_v28 = vadd.f32 %v731_v27, %v2160_v29  ;;  %v1750_v30 = vpop.f32.mrb[7].mxu1 }
 0x6a8   :  { %811 = vrot.lane.b32.xlu0 %v732_v28, %s2032_s4 }
 0x6ac   :  { %66 = vperm.xlu0 %1962, %v40_v31  }
 0x71a   :  { %v812_v32 = vpop.permute.xlu0 %811 }
 0x71b   :  { %v814_v33 = vadd.f32 %v812_v32, %v806_v24 }
 0x71d   :  { %1982 = vtanh.f32 %v814_v33 }
 0x727   :  { %v1983_v34 = vpop.eup %1982 }
 0x728   :  { %817 = vrot.lane.b32.xlu1 %v1983_v34, %s2033_s18  ;;  %v2034_v34 = vmov 1934713408  }
 0x72b   :  { %v67_v35 = vpop.permute.xlu0 %66 }
 0x72c   :  { %v92_v36 = vmul.f32 %v2150_v22, %v67_v35  ;;  %v1503_v35 = vunpack.c.l.s4 %v2034_v34 }
 0x72e   :  { %v104_v37 = vadd.f32 %v2155_v26, %v92_v36 }
 0x730   :  { %v894_v38 = vadd.f32 %v806_v24, %v104_v37  ;;  %v2001_v37 = vld.sshfl [vmem:[#allocation2] sm:$0xf pattern:$0x76325410] }
 0x732   :  { %1984 = vtanh.f32 %v894_v38  ;;  %v1504_v38 = vunpack.c.0.s8 %v1503_v35 }
 0x73c   :  { %v1985_v39 = vpop.eup %1984 }
 0x73d   :  { %1782 = vmatmul.mubr.msk.f32.vlgmr.msra.gmra.mrb[10].mxu0 %vm111_vm1, %v1985_v39 }
 0x73e   :  { %1924 = vmatpush3.bf16.msra.mxu0 %v2082_v4  ;;  %1803 = vmatprep.mubr.msk.f32.mxu0 %vm2029_vm0, %v2030_v6 }
 0x73f   :  { %1925 = vmatprep.subr.bf16.mxu0 %v2028_v3 }
 0x742   :  { %1927 = vmatpush3.bf16.msra.mxu0 %v2103_v12 }
 0x743   :  { %1934 = vmatprep.subr.bf16.mxu0 %v2028_v3 }
 0x79a   :  { %v818_v40 = vpop.permute.xlu1 %817 }
 0x79b   :  { %821 = vst.msk [vmem:[#allocation2 + $0x6] sm:$0x3] %vm343_vm2, %v818_v40  ;;  %1771 = vmatmul.mubr.msk.f32.vlgmr.msra.gmra.mrb[8].mxu1 %vm111_vm1, %v818_v40  ;;  %v1507_v40 = vsub.s32 %v1504_v38, %v2141_v19 }
 0x79c   :  { %1918 = vmatpush3.bf16.msra.mxu1 %v2105_v13  ;;  %1792 = vmatprep.mubr.msk.f32.mxu1 %vm2029_vm0, %v2030_v6 }
 0x79d   :  { %1919 = vmatprep.subr.bf16.mxu1 %v2028_v3 }
 0x7a0   :  { %1921 = vmatpush3.bf16.msra.mxu1 %v2114_v15 }
 0x7a1   :  { %1928 = vmatprep.subr.bf16.mxu1 %v2028_v3 }
 0x7a2   :  { %v2000_v36 = vld.sshfl [vmem:[#allocation2 + $0x2] sm:$0xf pattern:$0x76325410] }
 0x810   :  { %v965_v41 = vpop.f32.mrb[10].mxu0 }
 0x811   :  { %v1783_v42 = vpop.f32.mrb[11].mxu0 }
 0x812   :  { %v1521_v42 = vsub.s32 3, %v2141_v19 }
 0x86e   :  { %v890_v43 = vpop.f32.mrb[8].mxu1 }
 0x86f   :  { %v891_v44 = vadd.f32 %v890_v43, %v2160_v29  ;;  %v1772_v45 = vpop.f32.mrb[9].mxu1 }
 0x871   :  { %970 = vrot.lane.b32.xlu1 %v891_v44, %s2032_s4 }
 0x875   :  { %71 = vperm.xlu1 %1963, %v41_v46   ;;  %v1522_v46 = vrot.slane %v2147_v21, %v1521_v42 }
 0x8e3   :  { %v971_v47 = vpop.permute.xlu1 %970 }
 0x8e4   :  { %v973_v48 = vadd.f32 %v971_v47, %v965_v41 }
 0x8e6   :  { %1986 = vtanh.f32 %v973_v48 }
 0x8f0   :  { %v1987_v49 = vpop.eup %1986 }
 0x8f1   :  { %976 = vrot.lane.b32.xlu0 %v1987_v49, %s2033_s18 }
 0x8f4   :  { %v72_v50 = vpop.permute.xlu1 %71 }
 0x8f5   :  { %v93_v51 = vmul.f32 %v2150_v22, %v72_v50 }
 0x8f7   :  { %v105_v52 = vadd.f32 %v2155_v26, %v93_v51 }
 0x8f9   :  { %v1053_v53 = vadd.f32 %v965_v41, %v105_v52  ;;  %v1501_v41 = vcombine.low %v2001_v37, %v2000_v36 }
 0x8fb   :  { %1988 = vtanh.f32 %v1053_v53  ;;  %v1508_v44 = vrot.slane %v1501_v41, %v1507_v40 }
 0x905   :  { %v1989_v54 = vpop.eup %1988 }
 0x906   :  { %1804 = vmatmul.mubr.msk.f32.vlgmr.msra.gmra.mrb[12].mxu0 %vm111_vm1, %v1989_v54 }
 0x907   :  { %1936 = vmatpush3.bf16.msra.mxu0 %v2082_v4  ;;  %1825 = vmatprep.mubr.msk.f32.mxu0 %vm2029_vm0, %v2030_v6 }
 0x908   :  { %1937 = vmatprep.subr.bf16.mxu0 %v2028_v3 }
 0x90b   :  { %1939 = vmatpush3.bf16.msra.mxu0 %v2103_v12 }
 0x90c   :  { %1946 = vmatprep.subr.bf16.mxu0 %v2028_v3 }
 0x963   :  { %v977_v55 = vpop.permute.xlu0 %976 }
 0x964   :  { %980 = vst.msk [vmem:[#allocation2 + $0x8] sm:$0x3] %vm343_vm2, %v977_v55  ;;  %1793 = vmatmul.mubr.msk.f32.vlgmr.msra.gmra.mrb[10].mxu1 %vm111_vm1, %v977_v55 }
 0x965   :  { %1930 = vmatpush3.bf16.msra.mxu1 %v2105_v13  ;;  %1814 = vmatprep.mubr.msk.f32.mxu1 %vm2029_vm0, %v2030_v6 }
 0x966   :  { %1931 = vmatprep.subr.bf16.mxu1 %v2028_v3 }
 0x969   :  { %1933 = vmatpush3.bf16.msra.mxu1 %v2114_v15 }
 0x96a   :  { %1940 = vmatprep.subr.bf16.mxu1 %v2028_v3 }
 0x9d9   :  { %v1124_v56 = vpop.f32.mrb[12].mxu0 }
 0x9da   :  { %v1805_v57 = vpop.f32.mrb[13].mxu0 }
 0xa37   :  { %v1049_v58 = vpop.f32.mrb[10].mxu1 }
 0xa38   :  { %v1050_v59 = vadd.f32 %v1049_v58, %v2160_v29  ;;  %v1794_v60 = vpop.f32.mrb[11].mxu1 }
 0xa3a   :  { %1129 = vrot.lane.b32.xlu0 %v1050_v59, %s2032_s4 }
 0xa3e   :  { %76 = vperm.xlu0 %1962, %v42_v61  }
 0xaac   :  { %v1130_v62 = vpop.permute.xlu0 %1129 }
 0xaad   :  { %v1132_v63 = vadd.f32 %v1130_v62, %v1124_v56 }
 0xaaf   :  { %1990 = vtanh.f32 %v1132_v63 }
 0xab9   :  { %v1991_v0 = vpop.eup %1990 }
 0xaba   :  { %1135 = vrot.lane.b32.xlu1 %v1991_v0, %s2033_s18 }
 0xabd   :  { %v77_v1 = vpop.permute.xlu0 %76 }
 0xabe   :  { %v94_v2 = vmul.f32 %v2150_v22, %v77_v1 }
 0xac0   :  { %v106_v5 = vadd.f32 %v2155_v26, %v94_v2 }
 0xac2   :  { %v1212_v7 = vadd.f32 %v1124_v56, %v106_v5 }
 0xac4   :  { %1992 = vtanh.f32 %v1212_v7 }
 0xace   :  { %v1993_v8 = vpop.eup %1992 }
 0xacf   :  { %1826 = vmatmul.mubr.msk.f32.vlgmr.msra.gmra.mrb[14].mxu0 %vm111_vm1, %v1993_v8 }
 0xad0   :  { %1948 = vmatpush3.bf16.msra.mxu0 %v2082_v4  ;;  %1847 = vmatprep.mubr.msk.f32.mxu0 %vm2029_vm0, %v2030_v6 }
 0xad1   :  { %1949 = vmatprep.subr.bf16.mxu0 %v2028_v3 }
 0xad4   :  { %1951 = vmatpush3.bf16.msra.mxu0 %v2103_v12 }
 0xb2c   :  { %v1136_v9 = vpop.permute.xlu1 %1135 }
 0xb2d   :  { %1139 = vst.msk [vmem:[#allocation2 + $0xa] sm:$0x3] %vm343_vm2, %v1136_v9  ;;  %1815 = vmatmul.mubr.msk.f32.vlgmr.msra.gmra.mrb[12].mxu1 %vm111_vm1, %v1136_v9 }
 0xb2e   :  { %1942 = vmatpush3.bf16.msra.mxu1 %v2105_v13  ;;  %1836 = vmatprep.mubr.msk.f32.mxu1 %vm2029_vm0, %v2030_v6 }
 0xb2f   :  { %1943 = vmatprep.subr.bf16.mxu1 %v2028_v3 }
 0xb32   :  { %1945 = vmatpush3.bf16.msra.mxu1 %v2114_v15 }
 0xba2   :  { %v1283_v4 = vpop.f32.mrb[14].mxu0 }
 0xba3   :  { %v1827_v10 = vpop.f32.mrb[15].mxu0 }
 0xc00   :  { %v1208_v11 = vpop.f32.mrb[12].mxu1 }
 0xc01   :  { %v1209_v14 = vadd.f32 %v1208_v11, %v2160_v29  ;;  %v1816_v12 = vpop.f32.mrb[13].mxu1 }
 0xc03   :  { %1288 = vrot.lane.b32.xlu1 %v1209_v14, %s2032_s4 }
 0xc07   :  { %81 = vperm.xlu1 %1963, %v43_v16  }
 0xc75   :  { %v1289_v13 = vpop.permute.xlu1 %1288 }
 0xc76   :  { %v1291_v17 = vadd.f32 %v1289_v13, %v1283_v4 }
 0xc78   :  { %1994 = vtanh.f32 %v1291_v17 }
 0xc82   :  { %v1995_v6 = vpop.eup %1994 }
 0xc83   :  { %1294 = vrot.lane.b32.xlu0 %v1995_v6, %s2033_s18 }
 0xc86   :  { %v82_v3 = vpop.permute.xlu1 %81 }
 0xc87   :  { %v95_v15 = vmul.f32 %v2150_v22, %v82_v3 }
 0xc89   :  { %v107_v18 = vadd.f32 %v2155_v26, %v95_v15 }
 0xc8b   :  { %v1371_v20 = vadd.f32 %v1283_v4, %v107_v18 }
 0xc8d   :  { %1996 = vtanh.f32 %v1371_v20 }
 0xc97   :  { %v1997_v23 = vpop.eup %1996 }
 0xc98   :  { %1458 = vst.msk [vmem:[#allocation3] sm:$0x3] %vm343_vm2, %v1997_v23  ;;  %1848 = vmatmul.mubr.msk.f32.vlgmr.msra.gmra.mrb[16].mxu0 %vm111_vm1, %v1997_v23 }
 0xcf5   :  { %v1295_v24 = vpop.permute.xlu0 %1294 }
 0xcf6   :  { %1298 = vst.msk [vmem:[#allocation2 + $0xc] sm:$0x3] %vm343_vm2, %v1295_v24  ;;  %1837 = vmatmul.mubr.msk.f32.vlgmr.msra.gmra.mrb[14].mxu1 %vm111_vm1, %v1295_v24 }
 0xd6b   :  { %v1442_v25 = vpop.f32.mrb[16].mxu0 }
 0xd6c   :  { %v1849_v27 = vpop.f32.mrb[17].mxu0 }
 0xdc9   :  { %v1367_v28 = vpop.f32.mrb[14].mxu1 }
 0xdca   :  { %v1368_v30 = vadd.f32 %v1367_v28, %v2160_v29  ;;  %v1838_v22 = vpop.f32.mrb[15].mxu1  ;;  %v2002_v29 = vld.sshfl [vmem:[#allocation2 + $0x8] sm:$0xf pattern:$0x76325410] }
 0xdcc   :  { %1447 = vrot.lane.b32.xlu0 %v1368_v30, %s2032_s4 }
 0xe3e   :  { %v1448_v26 = vpop.permute.xlu0 %1447 }
 0xe3f   :  { %v1450_v31 = vadd.f32 %v1448_v26, %v1442_v25 }
 0xe41   :  { %1998 = vtanh.f32 %v1450_v31 }
 0xe4b   :  { %v1999_v32 = vpop.eup %1998 }
 0xe4c   :  { %1453 = vrot.lane.b32.xlu1 %v1999_v32, %s2033_s18 }
 0xebe   :  { %v1454_v33 = vpop.permute.xlu1 %1453 }
 0xebf   :  { %1457 = vst.msk [vmem:[#allocation2 + $0xe] sm:$0x3] %vm343_vm2, %v1454_v33  ;;  %1460 = vst.msk [vmem:[#allocation3 + $0x2] sm:$0x3] %vm343_vm2, %v1454_v33 }
 0xec6   :  { %v2003_v39 = vld.sshfl [vmem:[#allocation2 + $0xa] sm:$0xf pattern:$0x76325410] }
 0xec7   :  { %v1509_v43 = vcombine.low %v2002_v29, %v2003_v39 }
 0xec9   :  { %v1516_v45 = vrot.slane %v1509_v43, %v1507_v40 }
 0xecb   :  { %v1518_v47 = vcombine.high %v1508_v44, %v1516_v45  ;;  %v1517_v48 = vcombine.low %v1508_v44, %v1516_v45 }
 0xecd   :  { %v1524_v49 = vmul.f32 %v1522_v46, %v1518_v47  ;;  %v1523_v50 = vmul.f32 %v1522_v46, %v1517_v48 }
 0xecf   :  { %v1528_v51 = vsel %vm111_vm1, %v1524_v49, 0.0  ;;  %v1525_v52 = vsel %vm111_vm1, %v1523_v50, 0.0 }
 0xed0   :  { %1529 = vadd.xlane.f32.xlu1 %v1528_v51  ;;  %1526 = vadd.xlane.f32.xlu0 %v1525_v52 }
 0xed1   :  { %2015 = shalt.err (!%p2012_p4)
}
 0xed2   :  { %s2016_s12 = scalar_lea.hbm %s2355_s6, 64 }
 0xed3   :  { %p2017_p5 = scmp.ne.s32.totalorder %s2355_s6, %s2016_s12  ;;  %p2020_p6 = scmp.lt.u32.totalorder %s2016_s12, %s2355_s6 }
 0xed5   :  { %p2022_p7 = pnand %p2020_p6, %p2017_p5 }
 0xed7   :  { %2025 = shalt.err (!%p2022_p7)
}
 0xed8   :  { %s2036_s16 = smov 2   ;;  %v1533_v53 = vsub.s32 4, %v2141_v19  ;;  %vm1537_vm3 = vcmask 7168  }
 0xed9   :  { %1553 = dma.vmem_to_hbm [thread:$0]  %s1548_s9, 64, %s2355_s6, [#allocation4], %s2032_s4, %s2032_s4, %s2036_s16  }
 0xeda   :  { %v1534_v54 = vrot.slane %v2147_v21, %v1533_v53 }
 0xf5d   :  { %v1530_v55 = vpop.xlane.xlu1 %1529  ;;  %v1527_v56 = vpop.xlane.xlu0 %1526 }
 0xf5e   :  { %v1536_v57 = vadd.f32 %v1534_v54, %v1530_v55  ;;  %v1535_v58 = vadd.f32 %v1534_v54, %v1527_v56 }
 0xf60   :  { %1539 = vst.msk [vmem:[%s2354_s5 + $0x8] sm:$0xff] %vm1537_vm3, %v1536_v57  ;;  %1538 = vst.msk [vmem:[%s2354_s5] sm:$0xff] %vm1537_vm3, %v1535_v58 }
 0xf61   :  { %2026 = dma.done.wait [#allocation4], 64  }
 0xf62   :  { %2027 = vsyncadd [#allocation4], 4294967232 }
 0xf63   :  { %1559 = vsyncpa [#allocation4], 1 }

</bundles_post_ra>
